<compile_context>
chip_gen: v7x
topology: tpu7x:2x2x1
jax: 0.10.0
libtpu: 0.0.40
codegen_flags: <defaults>
</compile_context>

<pallas_src>
import functools

import jax
import jax.numpy as jnp
from jax.experimental import pallas as pl
from jax.experimental.pallas import tpu as pltpu


# ----------------------------------------------------------------------------
# One-time parameter preparation (hoisted out of the per-call path).
# ----------------------------------------------------------------------------
def fold_io_normalization_params(umean, ustd, wx, wu, b,
                                 *, compute_dtype=jnp.bfloat16):
    """Folds (u - umean)/ustd into the u-weights / bias and pre-casts operands.

    NOTE: assumes ustd entries are not tiny -- folding Wu/ustd into bf16 loses
    more relative precision than normalizing activations would if 1/ustd is
    very large.
    """
    inv_std = 1.0 / ustd
    wu_folded = wu * inv_std[:, None]                       # (nu, nx)
    b_folded = b - (umean * inv_std) @ wu                   # (nx,)
    return dict(
        wx=wx.astype(compute_dtype),                        # (nx, nx)
        wu=wu_folded.astype(compute_dtype),                 # (nu, nx)
        b=b_folded.reshape(1, -1).astype(jnp.float32),      # (1, nx), f32 epilogue
        compute_dtype=compute_dtype,
    )


# ----------------------------------------------------------------------------
# Single-step module forward (no wrapper-side concat, no per-call folding).
# ----------------------------------------------------------------------------
def _io_norm_f_step_kernel(x_ref, u_ref, wx_ref, wu_ref, b_ref, o_ref,
                           *, compute_dtype):
    # bf16 operands -> single-pass MXU; f32 accumulate; f32 bias + tanh epilogue.
    acc = jnp.dot(x_ref[...].astype(compute_dtype), wx_ref[...],
                  preferred_element_type=jnp.float32)
    acc = acc + jnp.dot(u_ref[...].astype(compute_dtype), wu_ref[...],
                        preferred_element_type=jnp.float32)
    o_ref[...] = jnp.tanh(acc + b_ref[...]).astype(o_ref.dtype)


def io_normalization_f(x, u, params):
    """Module forward: fun(x, (u - umean)/ustd), fun = linear-tanh transition."""
    B, nx = x.shape
    _, nu = u.shape
    full = lambda shape: pl.BlockSpec(shape, lambda: (0,) * len(shape))
    kernel = functools.partial(_io_norm_f_step_kernel,
                               compute_dtype=params["compute_dtype"])
    return pl.pallas_call(
        kernel,
        out_shape=jax.ShapeDtypeStruct((B, nx), jnp.float32),
        in_specs=[full((B, nx)), full((B, nu)),
                  full((nx, nx)), full((nu, nx)), full((1, nx))],
        out_specs=full((B, nx)),
    )(x, u, params["wx"], params["wu"], params["b"])


# ----------------------------------------------------------------------------
# grid=(T/chunk,) rollout: weights VMEM-resident, state carried in f32 scratch.
# ----------------------------------------------------------------------------
def _io_norm_f_rollout_kernel(x0_ref, u_ref, wx_ref, wu_ref, b_ref, o_ref,
                              x_sc, *, chunk, nx, compute_dtype):
    @pl.when(pl.program_id(0) == 0)
    def _():
        x_sc[...] = x0_ref[...]          # state carried across grid steps in f32

    wx = wx_ref[...]                      # resident (constant index_map)
    wu = wu_ref[...]
    b = b_ref[...]                        # (1, nx), f32

    x = x_sc[...]                         # register-carried within the chunk
    for i in range(chunk):                # short fixed trip count: fully unrolled
        acc = jnp.dot(x.astype(compute_dtype), wx,
                      preferred_element_type=jnp.float32)
        acc = acc + jnp.dot(u_ref[i].astype(compute_dtype), wu,
                            preferred_element_type=jnp.float32)
        x = jnp.tanh(acc + b)             # f32 epilogue, f32 carry
        # Lane-dense output slab: step i fills lanes [i*nx, (i+1)*nx) of the
        # (B, chunk*nx) block; the full block (last dim a multiple of 128) is
        # written back densely once per grid step.
        o_ref[:, i * nx:(i + 1) * nx] = x
    x_sc[...] = x                         # persist carry for the next grid step


def io_normalization_f_rollout(x0, u_seq, params, *, chunk=8):
    """Applies the module forward T times: x_{t+1} = fun(x_t, (u_t - umean)/ustd)."""
    T, B, nu = u_seq.shape
    _, nx = x0.shape
    assert T % chunk == 0, "T must be a multiple of the chunk size"
    # TODO(synk): for multiple independent sequences, add a leading "parallel"
    # batch grid axis so both v7x TensorCores get work; the T axis stays
    # "arbitrary" because of the state carry.
    kernel = functools.partial(_io_norm_f_rollout_kernel, chunk=chunk, nx=nx,
                               compute_dtype=params["compute_dtype"])
    out = pl.pallas_call(
        kernel,
        out_shape=jax.ShapeDtypeStruct((B, T * nx), jnp.float32),
        grid=(T // chunk,),
        in_specs=[
            pl.BlockSpec((B, nx), lambda t: (0, 0)),            # x0 (used at t == 0)
            pl.BlockSpec((chunk, B, nu), lambda t: (t, 0, 0)),   # u chunk for this step
            pl.BlockSpec((nx, nx), lambda t: (0, 0)),            # Wx   (resident)
            pl.BlockSpec((nu, nx), lambda t: (0, 0)),            # Wu'  (resident)
            pl.BlockSpec((1, nx), lambda t: (0, 0)),             # b'   (resident)
        ],
        out_specs=pl.BlockSpec((B, chunk * nx), lambda t: (0, t)),
        scratch_shapes=[pltpu.VMEM((B, nx), jnp.float32)],       # carried state, f32
        compiler_params=pltpu.CompilerParams(
            dimension_semantics=("arbitrary",)),
    )(x0, u_seq, params["wx"], params["wu"], params["b"])
    # (B, T*nx) -> (T, B, nx): one wrapper-side reshape/transpose per rollout.
    return out.reshape(B, T, nx).transpose(1, 0, 2)


if __name__ == "__main__":
    key = jax.random.PRNGKey(0)
    kx, ku, kus, km, ks, kwx, kwu, kb = jax.random.split(key, 8)

    B, nx, nu, T = 8, 32, 16, 32

    x = jax.random.normal(kx, (B, nx), dtype=jnp.float32)
    u = jax.random.normal(ku, (B, nu), dtype=jnp.float32)
    u_seq = jax.random.normal(kus, (T, B, nu), dtype=jnp.float32)
    umean = jax.random.normal(km, (nu,), dtype=jnp.float32)
    ustd = jax.random.uniform(ks, (nu,), minval=0.5, maxval=1.5,
                              dtype=jnp.float32)
    wx = jax.random.normal(kwx, (nx, nx), dtype=jnp.float32) * 0.1
    wu = jax.random.normal(kwu, (nu, nx), dtype=jnp.float32) * 0.1
    b = jax.random.normal(kb, (nx,), dtype=jnp.float32) * 0.1

    hi = jax.lax.Precision.HIGHEST

    # ---- single-step reference (the module forward) ----
    un = (u - umean[None, :]) / ustd[None, :]
    ref_step = jnp.tanh(jnp.dot(x, wx, precision=hi)
                        + jnp.dot(un, wu, precision=hi) + b[None, :])

    # bf16-operand / f32-accumulate path (default, MXU-native on v5e/v6e/v7x)
    params_bf16 = fold_io_normalization_params(umean, ustd, wx, wu, b)
    out_bf16 = jax.block_until_ready(io_normalization_f(x, u, params_bf16))
    assert jnp.allclose(out_bf16, ref_step, atol=5e-2, rtol=5e-2)

    # f32-operand path (same kernel, different one-time param cast)
    params_f32 = fold_io_normalization_params(umean, ustd, wx, wu, b,
                                              compute_dtype=jnp.float32)
    out_f32 = jax.block_until_ready(io_normalization_f(x, u, params_f32))
    assert jnp.allclose(out_f32, ref_step, atol=5e-2, rtol=5e-2)

    # ---- T-step rollout reference (module forward applied T times) ----
    def step(xc, u_t):
        unc = (u_t - umean[None, :]) / ustd[None, :]
        xn = jnp.tanh(jnp.dot(xc, wx, precision=hi)
                      + jnp.dot(unc, wu, precision=hi) + b[None, :])
        return xn, xn

    _, ref_traj = jax.lax.scan(step, x, u_seq)

    traj = jax.block_until_ready(
        io_normalization_f_rollout(x, u_seq, params_bf16, chunk=8))
    assert traj.shape == (T, B, nx)
    assert jnp.allclose(traj, ref_traj, atol=1e-1, rtol=1e-1)

    print("KERNEL_OK")
</pallas_src>

<mosaic_0001>
module attributes {stable_mosaic.version = 11 : i64} {
  func.func @_io_norm_f_step_kernel(%arg0: memref<8x32xf32, #tpu.memory_space<vmem>>, %arg1: memref<8x16xf32, #tpu.memory_space<vmem>>, %arg2: memref<32x32xbf16, #tpu.memory_space<vmem>>, %arg3: memref<16x32xbf16, #tpu.memory_space<vmem>>, %arg4: memref<1x32xf32, #tpu.memory_space<vmem>>, %arg5: memref<8x32xf32, #tpu.memory_space<vmem>>) attributes {dimension_semantics = [], scalar_prefetch = 0 : i64, scratch_operands = 0 : i64, tpu.core_type = #tpu.core_type<tc>} {
    %c0 = arith.constant 0 : index
    %c0_0 = arith.constant 0 : index
    %0 = vector.load %arg0[%c0, %c0_0] : memref<8x32xf32, #tpu.memory_space<vmem>>, vector<8x32xf32>
    %1 = arith.truncf %0 : vector<8x32xf32> to vector<8x32xbf16>
    %c0_1 = arith.constant 0 : index
    %c0_2 = arith.constant 0 : index
    %2 = vector.load %arg2[%c0_1, %c0_2] : memref<32x32xbf16, #tpu.memory_space<vmem>>, vector<32x32xbf16>
    %cst = arith.constant dense<0.000000e+00> : vector<8x32xf32>
    %3 = tpu.matmul %1, %2, %cst {dimension_numbers = #tpu.dot_dimension_numbers<[1], [0], [0], [1], [0, 0, 1, 1], [], []>} : vector<8x32xbf16>, vector<32x32xbf16>, vector<8x32xf32> -> vector<8x32xf32>
    %c0_3 = arith.constant 0 : index
    %c0_4 = arith.constant 0 : index
    %4 = vector.load %arg1[%c0_3, %c0_4] : memref<8x16xf32, #tpu.memory_space<vmem>>, vector<8x16xf32>
    %5 = arith.truncf %4 : vector<8x16xf32> to vector<8x16xbf16>
    %c0_5 = arith.constant 0 : index
    %c0_6 = arith.constant 0 : index
    %6 = vector.load %arg3[%c0_5, %c0_6] : memref<16x32xbf16, #tpu.memory_space<vmem>>, vector<16x32xbf16>
    %cst_7 = arith.constant dense<0.000000e+00> : vector<8x32xf32>
    %7 = tpu.matmul %5, %6, %cst_7 {dimension_numbers = #tpu.dot_dimension_numbers<[1], [0], [0], [1], [0, 0, 1, 1], [], []>} : vector<8x16xbf16>, vector<16x32xbf16>, vector<8x32xf32> -> vector<8x32xf32>
    %8 = arith.addf %3, %7 : vector<8x32xf32>
    %c0_8 = arith.constant 0 : index
    %c0_9 = arith.constant 0 : index
    %9 = vector.load %arg4[%c0_8, %c0_9] : memref<1x32xf32, #tpu.memory_space<vmem>>, vector<1x32xf32>
    %10 = vector.broadcast %9 : vector<1x32xf32> to vector<8x32xf32>
    %11 = arith.addf %8, %10 : vector<8x32xf32>
    %12 = math.tanh %11 : vector<8x32xf32>
    %c0_10 = arith.constant 0 : index
    %c0_11 = arith.constant 0 : index
    %13 = vector.load %arg5[%c0_10, %c0_11] : memref<8x32xf32, #tpu.memory_space<vmem>>, vector<8x32xf32>
    tpu.vector_store %arg5[%c0_10, %c0_11], %12 {strides = array<i32>} : memref<8x32xf32, #tpu.memory_space<vmem>>, vector<8x32xf32>,
    return
  }
}

</mosaic_0001>

<bundles_post_ra>
// kernel: tpu_custom_call.1
= control target key start
LH: loop header
LB: loop body
LE: loop exit
PB: predicated region body
PF: predicated region fallthrough
CT: control target
= control target key end

     0   :  { %10 = vsyncpa [#allocation3], 0  ;;  %s427_s0 = inlined_call_operand.hbm [shape: f32[8,32], index: 0, kind: input, shape index: {}]   ;;  %s428_s1 = inlined_call_operand.hbm [shape: f32[8,16], index: 1, kind: input, shape index: {}]   ;;  %s429_s2 = inlined_call_operand.hbm [shape: bf16[32,32], index: 2, kind: input, shape index: {}]   ;;  %s430_s3 = inlined_call_operand.vmem [shape: bf16[16,32], index: 3, kind: input, shape index: {}]   ;;  %s431_s4 = inlined_call_operand.vmem [shape: f32[1,32], index: 4, kind: input, shape index: {}]   ;;  %s432_s5 = inlined_call_operand.hbm [shape: f32[8,32], index: 5, kind: output, shape index: {}]  }
   0x1   :  { %11 = vsyncpa [#allocation6], 0 }
   0x2   :  { %12 = vsyncpa [#allocation4], 0  ;;  %s333_s18 = smov [#allocation5]   ;;  %s334_s20 = smov [#allocation2]  }
   0x3   :  { %s29_s19 = sshll.u32 %s333_s18, 4  ;;  %s19_s21 = sshll.u32 %s334_s20, 4  ;;  %s30_s19 = int_to_ptr.vmem [resolvable:$true] %s29_s19  ;;  %s20_s21 = int_to_ptr.vmem [resolvable:$true] %s19_s21 }
   0x4   :  { %s239_s24 = scalar_lea.hbm %s428_s1, 128 }
   0x5   :  { %p240_p0 = scmp.ne.s32.totalorder %s428_s1, %s239_s24  ;;  %p243_p1 = scmp.lt.u32.totalorder %s239_s24, %s428_s1 }
   0x7   :  { %p245_p2 = pnand %p243_p1, %p240_p0 }
   0x9   :  { %248 = shalt.err (!%p245_p2)
}
   0xa   :  { %s249_s29 = scalar_lea.vmem %s30_s19, 128  ;;  %p254_p4 = scmp.lt.s32.totalorder %s30_s19, %s30_s19 }
   0xb   :  { %p250_p3 = scmp.ne.s32.totalorder %s30_s19, %s249_s29  ;;  %p255_p5 = scmp.lt.s32.totalorder %s249_s29, %s249_s29 }
   0xd   :  { %p256_p6 = por %p255_p5, %p254_p4 }
   0xf   :  { %p257_p7 = pnand %p256_p6, %p250_p3 }
  0x11   :  { %260 = shalt.err (!%p257_p7)
}
  0x12   :  { %32 = dma.hbm_to_vmem [thread:$0]  %s428_s1, 128, %s30_s19, [#allocation6]  }
  0x13   :  { %s261_s9 = scalar_lea.hbm %s427_s0, 128 }
  0x14   :  { %p262_p8 = scmp.ne.s32.totalorder %s427_s0, %s261_s9  ;;  %p265_p9 = scmp.lt.u32.totalorder %s261_s9, %s427_s0 }
  0x16   :  { %p267_p10 = pnand %p265_p9, %p262_p8 }
  0x18   :  { %270 = shalt.err (!%p267_p10)
}
  0x19   :  { %s271_s14 = scalar_lea.vmem %s20_s21, 128  ;;  %p276_p12 = scmp.lt.s32.totalorder %s20_s21, %s20_s21 }
  0x1a   :  { %p272_p11 = scmp.ne.s32.totalorder %s20_s21, %s271_s14  ;;  %p277_p13 = scmp.lt.s32.totalorder %s271_s14, %s271_s14 }
  0x1c   :  { %p278_p0 = por %p277_p13, %p276_p12 }
  0x1e   :  { %p279_p1 = pnand %p278_p0, %p272_p11 }
  0x20   :  { %282 = shalt.err (!%p279_p1)
}
  0x21   :  { %22 = dma.hbm_to_vmem [thread:$0]  %s427_s0, 128, %s20_s21, [#allocation3]  }
  0x22   :  { %s335_s16 = smov [#allocation7]   ;;  %s283_s20 = scalar_lea.hbm %s429_s2, 256 }
  0x23   :  { %s38_s17 = sshll.u32 %s335_s16, 4  ;;  %p284_p2 = scmp.ne.s32.totalorder %s429_s2, %s283_s20  ;;  %s39_s17 = int_to_ptr.vmem [resolvable:$true] %s38_s17 }
  0x24   :  { %p287_p3 = scmp.lt.u32.totalorder %s283_s20, %s429_s2 }
  0x26   :  { %p289_p4 = pnand %p287_p3, %p284_p2 }
  0x28   :  { %292 = shalt.err (!%p289_p4)
}
  0x29   :  { %s293_s26 = scalar_lea.vmem %s39_s17, 256  ;;  %p298_p6 = scmp.lt.s32.totalorder %s39_s17, %s39_s17 }
  0x2a   :  { %p294_p5 = scmp.ne.s32.totalorder %s39_s17, %s293_s26  ;;  %p299_p7 = scmp.lt.s32.totalorder %s293_s26, %s293_s26 }
  0x2c   :  { %p300_p8 = por %p299_p7, %p298_p6 }
  0x2e   :  { %p301_p9 = pnand %p300_p8, %p294_p5 }
  0x30   :  { %304 = shalt.err (!%p301_p9)
}
  0x31   :  { %s336_s0 = smov 64   ;;  %s337_s21 = smov 4  }
  0x32   :  { %44 = dma.hbm_to_vmem [thread:$0]  %s429_s2, 256, %s39_s17, [#allocation6], %s336_s0, %s336_s0, %s337_s21  }
  0x33   :  { %327 = dma.done.wait [#allocation3], 128  }
  0x34   :  { %328 = vsyncadd [#allocation3], 4294967168 }
  0x35   :  { %329 = dma.done.wait [#allocation6], 384  }
  0x36   :  { %330 = vsyncadd [#allocation6], 4294966912  ;;  %v338_v0 = vmov 0.0   ;;  %vm339_vm0 = vmmov 0   ;;  %v234_v1 = vld [vmem:[#allocation7] sm:$0xff]   ;;  %v235_v2 = vld [vmem:[%s430_s3] sm:$0xff]  }
  0x37   :  { %218 = vmatprep.subr.bf16.mxu1 %v338_v0  ;;  %212 = vmatprep.subr.bf16.mxu0 %v338_v0  ;;  %v65_v3 = vld [vmem:[#allocation5] sm:$0xff]  ;;  %vm75_vm1 = vcmask 130048   ;;  %v236_v5 = vld [vmem:[#allocation7 + $0x8] sm:$0xff]   ;;  %v59_v6 = vld [vmem:[#allocation2] sm:$0xff]  ;;  %vm131_vm2 = vcmask 261120   ;;  %s340_s6 = smov [#allocation8]  }
  0x38   :  { %214 = vmatprep.mubr.msk.bf16.mxu0 %vm339_vm0, %v338_v0  ;;  %222 = vmatprep.mubr.msk.bf16.mxu1 %vm339_vm0, %v338_v0  ;;  %v66_v4 = vpack.c.bf16 %v65_v3, %v65_v3  ;;  %v60_v7 = vpack.c.bf16 %v59_v6, %v59_v6  ;;  %v206_v13 = vld [vmem:[%s431_s4] ss:$0 sm:$0xff]  ;;  %s191_s7 = sshll.u32 %s340_s6, 4  ;;  %s192_s7 = int_to_ptr.vmem [resolvable:$true] %s191_s7 }
  0x39   :  { %219 = vmatpush3.bf16.msra.mxu1 %v234_v1  ;;  %213 = vmatpush3.bf16.msra.mxu0 %v235_v2  ;;  %s305_s8 = scalar_lea.vmem %s192_s7, 128  ;;  %p310_p11 = scmp.lt.s32.totalorder %s192_s7, %s192_s7 }
  0x3a   :  { %220 = vmatprep.subr.bf16.mxu1 %v338_v0  ;;  %p306_p10 = scmp.ne.s32.totalorder %s192_s7, %s305_s8  ;;  %p311_p12 = scmp.lt.s32.totalorder %s305_s8, %s305_s8 }
  0x3c   :  { %215 = vmatmul.mubr.msk.bf16.vlgmr.msra.gmra.mrb[0].mxu0 %vm75_vm1, %v66_v4  ;;  %p312_p13 = por %p311_p12, %p310_p11 }
  0x3d   :  { %221 = vmatpush3.bf16.msra.mxu1 %v236_v5 }
  0x3e   :  { %p313_p0 = pnand %p312_p13, %p306_p10 }
  0x40   :  { %223 = vmatmul.mubr.msk.bf16.vlgmr.msra.gmra.mrb[0].mxu1 %vm131_vm2, %v60_v7 }
 0x10f   :  { %v113_v8 = vpop.f32.mrb[0].mxu0 }
 0x110   :  { %v216_v9 = vpop.f32.mrb[1].mxu0 }
 0x111   :  { %v116_v10 = vpop.f32.mrb[2].mxu0 }
 0x112   :  { %v217_v11 = vpop.f32.mrb[3].mxu0 }
 0x113   :  { %v169_v12 = vpop.f32.mrb[0].mxu1 }
 0x114   :  { %v170_v14 = vadd.f32 %v169_v12, %v113_v8  ;;  %v224_v15 = vpop.f32.mrb[1].mxu1 }
 0x115   :  { %v172_v16 = vpop.f32.mrb[2].mxu1 }
 0x116   :  { %v182_v17 = vadd.f32 %v206_v13, %v170_v14  ;;  %v225_v18 = vpop.f32.mrb[3].mxu1 }
 0x118   :  { %237 = vtanh.f32 %v182_v17 }
 0x122   :  { %v238_v19 = vpop.eup %237 }
 0x123   :  { %184 = vst.msk [vmem:[#allocation8] sm:$0xff] %vm131_vm2, %v238_v19 }
 0x124   :  { %316 = shalt.err (!%p313_p0)
}
 0x125   :  { %s317_s10 = scalar_lea.hbm %s432_s5, 128 }
 0x126   :  { %p318_p1 = scmp.ne.s32.totalorder %s432_s5, %s317_s10  ;;  %p321_p2 = scmp.lt.u32.totalorder %s317_s10, %s432_s5 }
 0x128   :  { %p323_p3 = pnand %p321_p2, %p318_p1 }
 0x12a   :  { %326 = shalt.err (!%p323_p3)
}
 0x12b   :  { %194 = dma.vmem_to_hbm [thread:$0]  %s192_s7, 128, %s432_s5, [#allocation4]  }
 0x12c   :  { %331 = dma.done.wait [#allocation4], 128  }
 0x12d   :  { %332 = vsyncadd [#allocation4], 4294967168 }
 0x12e   :  { %198 = vsyncpa [#allocation3], 1 }
 0x12f   :  { %199 = vsyncpa [#allocation6], 1 }
 0x130   :  { %200 = vsyncpa [#allocation4], 1 }

</bundles_post_ra>
